<compile_context>
chip_gen: v5e
topology: v5e:2x2
jax: 0.10.0
libtpu: 0.0.40
codegen_flags: <defaults>
</compile_context>

<pallas_src>
import jax
import jax.numpy as jnp
from jax.experimental import pallas as pl
from jax.experimental.pallas import tpu as pltpu  # noqa: F401  (TPU backend)

C_IN1, C_OUT1 = 10, 256      # Conv1d(10, 256, kernel_size=1)
C_IN2, C_OUT2 = 512, 1024    # Conv2d(512, 1024, kernel_size=1)
K_RAW = 2 * C_IN1            # folded contraction dim: (k, h) pairs = 20
K_PAD = 32                   # zero-padded to a clean bf16 sublane multiple


def _fused_kernel(xc_ref, wc_ref, bc_ref, o_ref):
    # xc_ref: (rows_p, K_PAD)  f32   rows = (batch, s), features = (k, h)
    # wc_ref: (K_PAD, 1024)    bf16  folded conv1 + bridge + conv2 weight
    # bc_ref: (1, 1024)        f32   folded bias
    # o_ref : (rows_p, 1024)   f32   lanes = output channels (lane-dense)
    xc = xc_ref[...].astype(jnp.bfloat16)
    y = jnp.dot(xc, wc_ref[...], preferred_element_type=jnp.float32)
    o_ref[...] = y + bc_ref[...]


def prepare_params(w1, b1, w2, b2):
    """One-time (offline) fold of Conv1d + bridge-regroup + Conv2d.

    y2[b,o,s] = sum_{c,h} w2[o,2c+h] * (sum_k w1[c,k]*x[b,k,s+h*S2] + b1[c]) + b2[o]
              = sum_{k,h} Wc[(k,h),o] * x[b,k,s+h*S2] + bc[o]
    """
    w1f = jnp.asarray(w1, jnp.float32)                                 # (256, 10)
    b1f = jnp.asarray(b1, jnp.float32)                                 # (256,)
    w2r = jnp.asarray(w2, jnp.float32).reshape(C_OUT2, C_IN2 // 2, 2)  # [o, c, h]
    b2f = jnp.asarray(b2, jnp.float32)                                 # (1024,)

    wc = jnp.einsum("och,ck->kho", w2r, w1f, precision="highest")      # (10, 2, 1024)
    wc = wc.reshape(K_RAW, C_OUT2)                                     # feature f = 2k + h
    wc = jnp.pad(wc, ((0, K_PAD - K_RAW), (0, 0))).astype(jnp.bfloat16)
    bc = b2f + jnp.einsum("och,c->o", w2r, b1f, precision="highest")
    return wc, bc.reshape(1, C_OUT2).astype(jnp.float32)


@jax.jit
def model_forward(x, params):
    """x: (B, 10, L) float32, L even  ->  (B, 1024 * (L // 2)) float32."""
    wc, bc = params
    B, C, L = x.shape
    assert C == C_IN1
    assert (C_OUT1 * L) % C_IN2 == 0, "bridge regroup needs 256*L % 512 == 0 (L even)"
    S2 = (C_OUT1 * L) // C_IN2                     # = L // 2
    rows = B * S2

    # Relayout input:  xc[b*S2 + s, 2k + h] = x[b, k, h*S2 + s]
    xr = x.reshape(B, C_IN1, 2, S2)
    xc = jnp.transpose(xr, (0, 3, 1, 2)).reshape(rows, K_RAW)
    xc = jnp.pad(xc, ((0, 0), (0, K_PAD - K_RAW)))

    rows_p = ((rows + 7) // 8) * 8                 # clean sublane multiple
    if rows_p != rows:
        xc = jnp.pad(xc, ((0, rows_p - rows), (0, 0)))

    cost = pl.CostEstimate(
        flops=2 * rows_p * K_PAD * C_OUT2,
        transcendentals=0,
        bytes_accessed=(rows_p * K_PAD * 4 + K_PAD * C_OUT2 * 2
                        + C_OUT2 * 4 + rows_p * C_OUT2 * 4),
    )

    # Single step, full-array VMEM blocks (everything is tiny: ~100 KiB total).
    y = pl.pallas_call(
        _fused_kernel,
        out_shape=jax.ShapeDtypeStruct((rows_p, C_OUT2), jnp.float32),
        cost_estimate=cost,
    )(xc, wc, bc)

    if rows_p != rows:
        y = y[:rows]
    # y[b*S2 + s, o] == y2[b, o, s]; the module's flatten is O-major.
    return jnp.transpose(y.reshape(B, S2, C_OUT2), (0, 2, 1)).reshape(B, C_OUT2 * S2)


if __name__ == "__main__":
    key = jax.random.PRNGKey(0)
    k_x, k_w1, k_b1, k_w2, k_b2 = jax.random.split(key, 5)

    B, L = 2, 8
    x = jax.random.normal(k_x, (B, C_IN1, L), dtype=jnp.float32)

    # Deterministic parameter init (shapes from the module's __init__).
    w1 = 0.1 * jax.random.normal(k_w1, (C_OUT1, C_IN1), dtype=jnp.float32)
    b1 = 0.1 * jax.random.normal(k_b1, (C_OUT1,), dtype=jnp.float32)
    w2 = 0.05 * jax.random.normal(k_w2, (C_OUT2, C_IN2), dtype=jnp.float32)
    b2 = 0.05 * jax.random.normal(k_b2, (C_OUT2,), dtype=jnp.float32)

    params = prepare_params(w1, b1, w2, b2)          # one-time fold + bf16 cast
    out = jax.block_until_ready(model_forward(x, params))

    S2 = (C_OUT1 * L) // C_IN2

    # Reference A: pure f32 bridged two-layer computation
    # (Conv1d -> contiguous (B,256,L)->(B,512,S2) regroup -> Conv2d -> flatten).
    f1 = jnp.einsum("oc,bcl->bol", w1, x, precision="highest") + b1[None, :, None]
    f2 = jnp.einsum("oc,bcs->bos", w2, f1.reshape(B, C_IN2, S2),
                    precision="highest") + b2[None, :, None]
    ref_f32 = f2.reshape(B, -1)

    # Reference B: emulate the kernel's exact precision recipe
    # (folded f32 weight rounded to bf16, bf16 activations, f32 accumulation).
    w2r = w2.reshape(C_OUT2, C_IN2 // 2, 2)
    wc_f = jnp.einsum("och,ck->kho", w2r, w1,
                      precision="highest").reshape(K_RAW, C_OUT2)
    bc_f = b2 + jnp.einsum("och,c->o", w2r, b1, precision="highest")
    xc_f = jnp.transpose(x.reshape(B, C_IN1, 2, S2), (0, 3, 1, 2)).reshape(B * S2, K_RAW)
    yb = jnp.dot(xc_f.astype(jnp.bfloat16).astype(jnp.float32),
                 wc_f.astype(jnp.bfloat16).astype(jnp.float32),
                 precision="highest") + bc_f[None, :]
    ref_bf16 = jnp.transpose(yb.reshape(B, S2, C_OUT2), (0, 2, 1)).reshape(B, -1)

    assert out.shape == (B, C_OUT2 * S2)
    assert jnp.allclose(out, ref_bf16, atol=2e-3, rtol=2e-3)
    assert jnp.allclose(out, ref_f32, atol=5e-2, rtol=5e-2)
    print("KERNEL_OK")
</pallas_src>

<mosaic_0001>
module attributes {stable_mosaic.version = 11 : i64} {
  func.func @_fused_kernel(%arg0: memref<8x32xf32, #tpu.memory_space<vmem>>, %arg1: memref<32x1024xbf16, #tpu.memory_space<vmem>>, %arg2: memref<1x1024xf32, #tpu.memory_space<vmem>>, %arg3: memref<8x1024xf32, #tpu.memory_space<vmem>>) attributes {dimension_semantics = [], scalar_prefetch = 0 : i64, scratch_operands = 0 : i64, tpu.core_type = #tpu.core_type<tc>} {
    %c0 = arith.constant 0 : index
    %c0_0 = arith.constant 0 : index
    %0 = vector.load %arg0[%c0, %c0_0] : memref<8x32xf32, #tpu.memory_space<vmem>>, vector<8x32xf32>
    %1 = arith.truncf %0 : vector<8x32xf32> to vector<8x32xbf16>
    %c0_1 = arith.constant 0 : index
    %c0_2 = arith.constant 0 : index
    %2 = vector.load %arg1[%c0_1, %c0_2] : memref<32x1024xbf16, #tpu.memory_space<vmem>>, vector<32x1024xbf16>
    %cst = arith.constant dense<0.000000e+00> : vector<8x1024xf32>
    %3 = tpu.matmul %1, %2, %cst {dimension_numbers = #tpu.dot_dimension_numbers<[1], [0], [0], [1], [0, 0, 1, 1], [], []>} : vector<8x32xbf16>, vector<32x1024xbf16>, vector<8x1024xf32> -> vector<8x1024xf32>
    %c0_3 = arith.constant 0 : index
    %c0_4 = arith.constant 0 : index
    %4 = vector.load %arg2[%c0_3, %c0_4] : memref<1x1024xf32, #tpu.memory_space<vmem>>, vector<1x1024xf32>
    %5 = vector.broadcast %4 : vector<1x1024xf32> to vector<8x1024xf32>
    %6 = arith.addf %3, %5 : vector<8x1024xf32>
    %c0_5 = arith.constant 0 : index
    %c0_6 = arith.constant 0 : index
    %7 = vector.load %arg3[%c0_5, %c0_6] : memref<8x1024xf32, #tpu.memory_space<vmem>>, vector<8x1024xf32>
    tpu.vector_store %arg3[%c0_5, %c0_6], %6 {strides = array<i32>} : memref<8x1024xf32, #tpu.memory_space<vmem>>, vector<8x1024xf32>,
    return
  }
}

</mosaic_0001>

<bundles_post_ra>
// kernel: model_forward.1
= control target key start
LH: loop header
LB: loop body
LE: loop exit
PB: predicated region body
PF: predicated region fallthrough
CT: control target
= control target key end

     0   :  { %vm131_vm0 = vcmask 261120   ;;  %s493_s1 = inlined_call_operand.vmem [shape: bf16[32,1024], index: 1, kind: input, shape index: {}]   ;;  %s494_s0 = inlined_call_operand.vmem [shape: f32[8,32], index: 0, kind: input, shape index: {}]   ;;  %s495_s2 = inlined_call_operand.vmem [shape: f32[1,1024], index: 2, kind: input, shape index: {}]   ;;  %s496_s3 = inlined_call_operand.vmem [shape: f32[8,1024], index: 3, kind: output, shape index: {}]  }
   0x1   :  { %v285_v0 = vld [vmem:[%s493_s1 + $0x40] sm:$0xf]  ;;  %v331_v2 = vld [vmem:[%s493_s1 + $0x44] sm:$0xf]  ;;  %v293_v5 = vld [vmem:[%s493_s1 + $0x48] sm:$0xf] }
   0x2   :  { %v335_v1 = vld [vmem:[%s493_s1 + $0x5c] sm:$0xf0]  ;;  %v287_v4 = vld [vmem:[%s493_s1 + $0x60] sm:$0xf0]  ;;  %v336_v6 = vld [vmem:[%s493_s1 + $0x64] sm:$0xf0] }
   0x3   :  { %v286_v3 = vor.u32 %v335_v1, %v285_v0  ;;  %v290_v7 = vor.u32 %v331_v2, %v287_v4  ;;  %v294_v8 = vor.u32 %v336_v6, %v293_v5  ;;  %v332_v9 = vld [vmem:[%s493_s1 + $0x4c] sm:$0xf]  ;;  %v253_v11 = vld [vmem:[%s493_s1] sm:$0xf]  ;;  %v323_v14 = vld [vmem:[%s493_s1 + $0x4] sm:$0xf] }
   0x4   :  { %v295_v10 = vld [vmem:[%s493_s1 + $0x68] sm:$0xf0]  ;;  %v327_v13 = vld [vmem:[%s493_s1 + $0x1c] sm:$0xf0]  ;;  %v255_v15 = vld [vmem:[%s493_s1 + $0x20] sm:$0xf0] }
   0x5   :  { %141 = vmatpush.bf16.msra.mxu0 %v286_v3  ;;  %v298_v12 = vor.u32 %v332_v9, %v295_v10  ;;  %154 = vmatpush.bf16.msra.mxu1 %v290_v7  ;;  %v254_v16 = vor.u32 %v327_v13, %v253_v11  ;;  %v258_v17 = vor.u32 %v323_v14, %v255_v15  ;;  %v261_v18 = vld [vmem:[%s493_s1 + $0x8] sm:$0xf]  ;;  %v324_v20 = vld [vmem:[%s493_s1 + $0xc] sm:$0xf]  ;;  %v15_v23 = vld [vmem:[%s494_s0] sm:$0xff] }
   0x6   :  { %167 = vmatpush.bf16.msra.mxu2 %v294_v8  ;;  %v328_v19 = vld [vmem:[%s493_s1 + $0x24] sm:$0xf0]  ;;  %v263_v22 = vld [vmem:[%s493_s1 + $0x28] sm:$0xf0]  ;;  %v309_v24 = vld [vmem:[%s493_s1 + $0x58] sm:$0xf]  ;;  %v16_v26 = vpack.c.bf16 %v15_v23, %v15_v23 }
   0x7   :  { %180 = vmatpush.bf16.msra.mxu3 %v298_v12  ;;  %v262_v21 = vor.u32 %v328_v19, %v261_v18  ;;  %v266_v25 = vor.u32 %v324_v20, %v263_v22  ;;  %v338_v27 = vld [vmem:[%s493_s1 + $0x74] sm:$0xf0]  ;;  %v334_v28 = vld [vmem:[%s493_s1 + $0x5c] sm:$0xf]  ;;  %v301_v32 = vld [vmem:[%s493_s1 + $0x50] sm:$0xf] }
   0x8   :  { %v311_v29 = vld [vmem:[%s493_s1 + $0x78] sm:$0xf0]  ;;  %v310_v30 = vor.u32 %v338_v27, %v309_v24  ;;  %v337_v33 = vld [vmem:[%s493_s1 + $0x6c] sm:$0xf0]  ;;  %v333_v34 = vld [vmem:[%s493_s1 + $0x54] sm:$0xf] }
   0x9   :  { %142 = vmatpush.bf16.msra.mxu0 %v254_v16  ;;  %v314_v31 = vor.u32 %v334_v28, %v311_v29  ;;  %155 = vmatpush.bf16.msra.mxu1 %v258_v17  ;;  %v302_v35 = vor.u32 %v337_v33, %v301_v32  ;;  %v303_v36 = vld [vmem:[%s493_s1 + $0x70] sm:$0xf0]  ;;  %v277_v37 = vld [vmem:[%s493_s1 + $0x18] sm:$0xf]  ;;  %v326_v41 = vld [vmem:[%s493_s1 + $0x1c] sm:$0xf] }
   0xa   :  { %168 = vmatpush.bf16.msra.mxu2 %v262_v21  ;;  %v330_v38 = vld [vmem:[%s493_s1 + $0x34] sm:$0xf0]  ;;  %v306_v39 = vor.u32 %v333_v34, %v303_v36  ;;  %v279_v42 = vld [vmem:[%s493_s1 + $0x38] sm:$0xf0]  ;;  %v269_v43 = vld [vmem:[%s493_s1 + $0x10] sm:$0xf] }
   0xb   :  { %181 = vmatpush.bf16.msra.mxu3 %v266_v25  ;;  %v278_v40 = vor.u32 %v330_v38, %v277_v37  ;;  %v282_v44 = vor.u32 %v326_v41, %v279_v42  ;;  %v329_v45 = vld [vmem:[%s493_s1 + $0x2c] sm:$0xf0]  ;;  %v325_v46 = vld [vmem:[%s493_s1 + $0x14] sm:$0xf]  ;;  %v33_v50 = vld [vmem:[%s495_s2] sm:$0xff] }
   0xc   :  { %315 = vmatmul.msk.bf16.vlgmr.msra.gmra.mxu0 %vm131_vm0, %v16_v26  ;;  %v271_v47 = vld [vmem:[%s493_s1 + $0x30] sm:$0xf0]  ;;  %316 = vmatmul.msk.bf16.vlgmr.msra.gmra.mxu1 %vm131_vm0, %v16_v26  ;;  %v270_v48 = vor.u32 %v329_v45, %v269_v43  ;;  %v35_v51 = vperm.slane %v33_v50, 0  ;;  %v36_v52 = vperm.slane %v33_v50, 1  ;;  %v37_v57 = vperm.slane %v33_v50, 2 }
   0xd   :  { %317 = vmatmul.msk.bf16.vlgmr.msra.gmra.mxu2 %vm131_vm0, %v16_v26  ;;  %193 = vmatpush.bf16.msrb.mxu0 %v302_v35  ;;  %v274_v49 = vor.u32 %v325_v46, %v271_v47  ;;  %v38_v58 = vperm.slane %v33_v50, 3  ;;  %v39_v1 = vperm.slane %v33_v50, 4  ;;  %v40_v2 = vperm.slane %v33_v50, 5 }
   0xe   :  { %219 = vmatpush.bf16.msrb.mxu2 %v310_v30  ;;  %318 = vmatmul.msk.bf16.vlgmr.msra.gmra.mxu3 %vm131_vm0, %v16_v26  ;;  %v41_v9 = vperm.slane %v33_v50, 6  ;;  %v42_v10 = vperm.slane %v33_v50, 7 }
   0xf   :  { %232 = vmatpush.bf16.msrb.mxu3 %v314_v31  ;;  %206 = vmatpush.bf16.msrb.mxu1 %v306_v39 }
  0x11   :  { %194 = vmatpush.bf16.msrb.mxu0 %v270_v48 }
  0x12   :  { %220 = vmatpush.bf16.msrb.mxu2 %v278_v40 }
  0x13   :  { %233 = vmatpush.bf16.msrb.mxu3 %v282_v44  ;;  %207 = vmatpush.bf16.msrb.mxu1 %v274_v49 }
  0x1c   :  { %319 = vmatmul.msk.bf16.vlgmr.msrb.gmra.mxu0 %vm131_vm0, %v16_v26  ;;  %320 = vmatmul.msk.bf16.vlgmr.msrb.gmra.mxu1 %vm131_vm0, %v16_v26 }
  0x1d   :  { %321 = vmatmul.msk.bf16.vlgmr.msrb.gmra.mxu2 %vm131_vm0, %v16_v26 }
  0x1e   :  { %322 = vmatmul.msk.bf16.vlgmr.msrb.gmra.mxu3 %vm131_vm0, %v16_v26 }
  0x89   :  { %v144_v53 = vpop.f32.mrf.mxu0  ;;  %v157_v55 = vpop.f32.mrf.mxu1 }
  0x8a   :  { %v145_v54 = vadd.f32 %v144_v53, %v35_v51  ;;  %v158_v56 = vadd.f32 %v157_v55, %v36_v52 }
  0x8c   :  { %239 = vst [vmem:[%s496_s3] sm:$0xff] %v145_v54 }
  0x8d   :  { %240 = vst [vmem:[%s496_s3 + $0x8] sm:$0xff] %v158_v56 }
  0x90   :  { %v170_v59 = vpop.f32.mrf.mxu2 }
  0x91   :  { %v171_v60 = vadd.f32 %v170_v59, %v37_v57  ;;  %v183_v61 = vpop.f32.mrf.mxu3  ;;  %v146_v62 = vpop.f32.mrf.mxu0 }
  0x92   :  { %v184_v63 = vadd.f32 %v183_v61, %v38_v58  ;;  %v159_v0 = vpop.f32.mrf.mxu1 }
  0x93   :  { %241 = vst [vmem:[%s496_s3 + $0x10] sm:$0xff] %v171_v60 }
  0x94   :  { %242 = vst [vmem:[%s496_s3 + $0x18] sm:$0xff] %v184_v63 }
  0x98   :  { %v172_v3 = vpop.f32.mrf.mxu2 }
  0x99   :  { %v185_v4 = vpop.f32.mrf.mxu3  ;;  %v196_v5 = vpop.f32.mrf.mxu0 }
  0x9a   :  { %v197_v6 = vadd.f32 %v196_v5, %v39_v1  ;;  %v209_v7 = vpop.f32.mrf.mxu1 }
  0x9b   :  { %v210_v8 = vadd.f32 %v209_v7, %v40_v2 }
  0x9c   :  { %243 = vst [vmem:[%s496_s3 + $0x20] sm:$0xff] %v197_v6 }
  0x9d   :  { %244 = vst [vmem:[%s496_s3 + $0x28] sm:$0xff] %v210_v8 }
  0xa0   :  { %v222_v11 = vpop.f32.mrf.mxu2 }
  0xa1   :  { %v223_v12 = vadd.f32 %v222_v11, %v41_v9  ;;  %v235_v13 = vpop.f32.mrf.mxu3  ;;  %v198_v14 = vpop.f32.mrf.mxu0 }
  0xa2   :  { %v236_v15 = vadd.f32 %v235_v13, %v42_v10  ;;  %v211_v16 = vpop.f32.mrf.mxu1 }
  0xa3   :  { %245 = vst [vmem:[%s496_s3 + $0x30] sm:$0xff] %v223_v12 }
  0xa4   :  { %246 = vst [vmem:[%s496_s3 + $0x38] sm:$0xff] %v236_v15 }
  0xa8   :  { %v224_v17 = vpop.f32.mrf.mxu2 }
  0xa9   :  { %v237_v18 = vpop.f32.mrf.mxu3 }

</bundles_post_ra>
